<compile_context>
chip_gen: v7x
topology: tpu7x:2x2x1
jax: 0.10.0
libtpu: 0.0.40
codegen_flags: <defaults>
</compile_context>

<pallas_src>
import functools

import jax
import jax.numpy as jnp
from jax.experimental import pallas as pl
from jax.experimental.pallas import tpu as pltpu

_LANE = 128
_MAX_BLOCK_ROWS = 4096   # 4096 x 128 x 4 B = 2 MiB f32 tile
_MIN_GRID_STEPS = 4      # enough steps for DMA/compute overlap + v7x megacore

# Required multiple of the second-minor (tiled) block dim, keyed by input
# dtype itemsize: f32 -> 8, bf16/f16 -> 16, int8 -> 32.
_SUBLANE_MULTIPLE = {4: 8, 2: 16, 1: 32}


def _qrange(dtype):
    if dtype == "quint8":
        return 0.0, 255.0
    if dtype == "qint8":
        return -128.0, 127.0
    raise ValueError(f"unsupported quantized dtype: {dtype}")


def _qhardswish_math(x_f32, *, inv_scale, scale, lo, hi):
    """quant -> hardswish -> requant -> dequant, zp folded into bounds, q-unit form."""
    qc = jnp.clip(jnp.round(x_f32 * inv_scale), lo, hi)          # q - zp
    # hardswish expressed in q-units: y * inv_scale == qc * clip(qc*scale+3,0,6)/6
    yq = qc * jnp.clip(qc * scale + 3.0, 0.0, 6.0) * (1.0 / 6.0)
    qo = jnp.clip(jnp.round(yq), lo, hi)                         # q_out - zp
    return qo * scale                                            # dequantized output


def _qhardswish_kernel(x_ref, o_ref, *, inv_scale, scale, lo, hi):
    # Cast to f32 inside the kernel so narrow inputs are read from HBM at their
    # native width (halves input traffic for bf16/f16 callers).
    x = x_ref[...].astype(jnp.float32)
    o_ref[...] = _qhardswish_math(x, inv_scale=inv_scale, scale=scale, lo=lo, hi=hi)


def _choose_block_rows(rows, sublane):
    """Pick a block height: <= 2 MiB f32 tile, aim for >= _MIN_GRID_STEPS steps."""
    target = pl.cdiv(rows, _MIN_GRID_STEPS)
    target = ((target + sublane - 1) // sublane) * sublane   # legal tiled block
    block = min(_MAX_BLOCK_ROWS, max(target, sublane))
    if block >= rows:
        return rows   # single full-extent block (exempt from tiling divisibility)
    return block


def _run_aligned(arr2d, *, inv_scale, scale, lo, hi):
    """arr2d: (rows, 128) in its native dtype. Returns (rows, 128) float32."""
    rows = arr2d.shape[0]
    sublane = _SUBLANE_MULTIPLE.get(arr2d.dtype.itemsize, 8)
    block_rows = _choose_block_rows(rows, sublane)
    grid = (pl.cdiv(rows, block_rows),)

    kernel = functools.partial(
        _qhardswish_kernel, inv_scale=inv_scale, scale=scale, lo=lo, hi=hi
    )
    return pl.pallas_call(
        kernel,
        out_shape=jax.ShapeDtypeStruct((rows, _LANE), jnp.float32),
        grid=grid,
        in_specs=[pl.BlockSpec((block_rows, _LANE), lambda i: (i, 0))],
        out_specs=pl.BlockSpec((block_rows, _LANE), lambda i: (i, 0)),
        compiler_params=pltpu.CompilerParams(
            dimension_semantics=("parallel",)
        ),
    )(arr2d)


def quantized_hardswish(x, scale, zero_point, dtype="quint8"):
    """x: float array (any shape, e.g. NCHW, f32/bf16/f16). Returns float32, same shape."""
    qmin, qmax = _qrange(dtype)
    scale = float(scale)
    zp = float(int(zero_point))
    inv_scale = 1.0 / scale
    lo = qmin - zp
    hi = qmax - zp

    orig_shape = x.shape
    n = x.size
    rem = n % _LANE

    if rem == 0:
        # Fast path (covers the NCHW test shapes): pure reshape to a lane-dense
        # (rows, 128) slab — no pad, no slice, no concat passes over HBM.
        out = _run_aligned(
            x.reshape(n // _LANE, _LANE),
            inv_scale=inv_scale, scale=scale, lo=lo, hi=hi,
        )
        return out.reshape(orig_shape)

    # Ragged path: kernel on the 128-aligned prefix, tiny jnp epilogue for the
    # <= 127-element tail (avoids full-tensor pad + slice HBM passes).
    flat = x.reshape(-1)
    main = n - rem
    parts = []
    if main:
        out_main = _run_aligned(
            flat[:main].reshape(main // _LANE, _LANE),
            inv_scale=inv_scale, scale=scale, lo=lo, hi=hi,
        )
        parts.append(out_main.reshape(-1))
    tail = _qhardswish_math(
        flat[main:].astype(jnp.float32),
        inv_scale=inv_scale, scale=scale, lo=lo, hi=hi,
    )
    parts.append(tail)
    return jnp.concatenate(parts).reshape(orig_shape)


if __name__ == "__main__":
    key = jax.random.PRNGKey(0)
    # Small NCHW input consistent with the PyTorch test.
    x = jax.random.normal(key, (2, 4, 16, 16), dtype=jnp.float32) * 3.0

    scale = 0.05
    zero_point = 128
    qdtype = "quint8"

    out = jax.block_until_ready(quantized_hardswish(x, scale, zero_point, qdtype))

    # Reference uses the exact same math helper (same constants, same op order),
    # validating the Pallas tiling/plumbing bit-for-bit.
    qmin, qmax = _qrange(qdtype)
    ref = _qhardswish_math(
        x.astype(jnp.float32),
        inv_scale=1.0 / float(scale),
        scale=float(scale),
        lo=qmin - float(zero_point),
        hi=qmax - float(zero_point),
    )

    assert out.shape == x.shape and out.dtype == jnp.float32
    max_err = float(jnp.max(jnp.abs(out - ref)))
    assert max_err <= 1e-5, f"mismatch vs reference: max err {max_err}"

    print("KERNEL_OK")
</pallas_src>

<mosaic_0001>
module attributes {stable_mosaic.version = 11 : i64} {
  func.func @_qhardswish_kernel(%arg0: i32, %arg1: memref<8x128xf32, #tpu.memory_space<vmem>>, %arg2: memref<8x128xf32, #tpu.memory_space<vmem>>) attributes {dimension_semantics = [#tpu.dimension_semantics<parallel>], iteration_bounds = array<i64: 2>, scalar_prefetch = 0 : i64, scratch_operands = 0 : i64, tpu.core_type = #tpu.core_type<tc>, window_params = [{transform_indices = @transform_0, window_bounds = array<i64: 8, 128>}, {transform_indices = @transform_1, window_bounds = array<i64: 8, 128>}]} {
    %c0 = arith.constant 0 : index
    %c0_0 = arith.constant 0 : index
    %0 = vector.load %arg1[%c0, %c0_0] : memref<8x128xf32, #tpu.memory_space<vmem>>, vector<8x128xf32>
    %cst = arith.constant 2.000000e+01 : f32
    %1 = vector.broadcast %cst : f32 to vector<8x128xf32>
    %2 = arith.mulf %0, %1 : vector<8x128xf32>
    %3 = math.roundeven %2 : vector<8x128xf32>
    %cst_1 = arith.constant -1.280000e+02 : f32
    %cst_2 = arith.constant 1.270000e+02 : f32
    %4 = vector.broadcast %cst_1 : f32 to vector<8x128xf32>
    %5 = arith.maximumf %4, %3 : vector<8x128xf32>
    %6 = vector.broadcast %cst_2 : f32 to vector<8x128xf32>
    %7 = arith.minimumf %6, %5 : vector<8x128xf32>
    %cst_3 = arith.constant 5.000000e-02 : f32
    %8 = vector.broadcast %cst_3 : f32 to vector<8x128xf32>
    %9 = arith.mulf %7, %8 : vector<8x128xf32>
    %cst_4 = arith.constant 3.000000e+00 : f32
    %10 = vector.broadcast %cst_4 : f32 to vector<8x128xf32>
    %11 = arith.addf %9, %10 : vector<8x128xf32>
    %cst_5 = arith.constant 0.000000e+00 : f32
    %cst_6 = arith.constant 6.000000e+00 : f32
    %12 = vector.broadcast %cst_5 : f32 to vector<8x128xf32>
    %13 = arith.maximumf %12, %11 : vector<8x128xf32>
    %14 = vector.broadcast %cst_6 : f32 to vector<8x128xf32>
    %15 = arith.minimumf %14, %13 : vector<8x128xf32>
    %16 = arith.mulf %7, %15 : vector<8x128xf32>
    %cst_7 = arith.constant 0.166666672 : f32
    %17 = vector.broadcast %cst_7 : f32 to vector<8x128xf32>
    %18 = arith.mulf %16, %17 : vector<8x128xf32>
    %19 = math.roundeven %18 : vector<8x128xf32>
    %cst_8 = arith.constant -1.280000e+02 : f32
    %cst_9 = arith.constant 1.270000e+02 : f32
    %20 = vector.broadcast %cst_8 : f32 to vector<8x128xf32>
    %21 = arith.maximumf %20, %19 : vector<8x128xf32>
    %22 = vector.broadcast %cst_9 : f32 to vector<8x128xf32>
    %23 = arith.minimumf %22, %21 : vector<8x128xf32>
    %cst_10 = arith.constant 5.000000e-02 : f32
    %24 = vector.broadcast %cst_10 : f32 to vector<8x128xf32>
    %25 = arith.mulf %23, %24 : vector<8x128xf32>
    %c0_11 = arith.constant 0 : index
    %c0_12 = arith.constant 0 : index
    %26 = vector.load %arg2[%c0_11, %c0_12] : memref<8x128xf32, #tpu.memory_space<vmem>>, vector<8x128xf32>
    tpu.vector_store %arg2[%c0_11, %c0_12], %25 {strides = array<i32>} : memref<8x128xf32, #tpu.memory_space<vmem>>, vector<8x128xf32>,
    return
  }
  func.func @transform_0(%arg0: i32) -> (i32, i32) {
    %c0_i32 = arith.constant 0 : i32
    %c0_i32_0 = arith.constant 0 : i32
    return %arg0, %c0_i32 : i32, i32
  }
  func.func @transform_1(%arg0: i32) -> (i32, i32) {
    %c0_i32 = arith.constant 0 : i32
    %c0_i32_0 = arith.constant 0 : i32
    return %arg0, %c0_i32 : i32, i32
  }
}

</mosaic_0001>

<bundles_post_ra>
// kernel: tpu_custom_call.1
= control target key start
LH: loop header
LB: loop body
LE: loop exit
PB: predicated region body
PF: predicated region fallthrough
CT: control target
= control target key end

     0   :  { %6 = vsyncpa [#allocation3], 0  ;;  %s563_s0 = inlined_call_operand.hbm [shape: f32[16,128], index: 0, kind: input, shape index: {}]   ;;  %s564_s1 = inlined_call_operand.hbm [shape: f32[16,128], index: 1, kind: output, shape index: {}]  }
   0x1   :  { %8 = vsyncpa [#allocation3 + $0x1], 0 }
   0x2   :  { %9 = vsyncpa [#allocation4], 0 }
   0x3   :  { %11 = vsyncpa [#allocation4 + $0x1], 0  ;;  %s402_s6 = smov 0   ;;  %s404_s7 = smov 0  }
   0x4   :  { %s406_s8 = smov 0   ;;  %s408_s9 = smov 0  }
   0x5 LB: > { %s423_s10 = sadd.s32 4294967295, %s388_s9   ;;  %s232_s11 = sadd.s32 4294967294, %s388_s9   ;;  %s388_s9 = sphi %s408_s9, %s579_s9   ;;  %s384_s8 = sphi %s406_s8, %s578_s8   ;;  %s380_s7 = sphi %s404_s7, %s577_s7   ;;  %s376_s6 = sphi %s402_s6, %s576_s6  }
   0x6   : > { %s427_s12 = sadd.s32 1, %s388_s9   ;;  %s24_s13 = sadd.s32 1, %s384_s8 }
   0x7   : > { %s21_s14 = ssub.s32 %s388_s9, %s427_s12  ;;  %p31_p0 = scmp.ne.s32.totalorder %s384_s8, %s380_s7 }
   0x8   : > { %p22_p1 = scmp.eq.s32.totalorder %s21_s14, 0  ;;  %p32_p2 = scmp.eq.s32.totalorder %s388_s9, 0 }
   0x9   : > { %p37_p3 = scmp.ne.s32.totalorder %s380_s7, %s376_s6  ;;  %p38_p4 = scmp.eq.s32.totalorder %s423_s10, 0 }
   0xa   : > { %s439_s15 = scalar_select %p22_p1, %s384_s8, %s24_s13  }
   0xb   : > { %p441_p5 = por %p32_p2, %p31_p0  ;;  %p445_p6 = por %p38_p4, %p37_p3 }
   0xc   : > { %p61_p7 = scmp.eq.s32.totalorder %s423_s10, 1  ;;  %p67_p8 = scmp.eq.s32.totalorder %s232_s11, 1 }
   0xd   : > { %p258_p10 = scmp.lt.s32.totalorder %s388_s9, 2  ;;  %s87_s20 = sand.u32 1, %s384_s8  }
   0xe   : > { %p452_p11 = por %p61_p7, %p31_p0  ;;  %p456_p12 = por %p67_p8, %p37_p3 }
   0xf   : > { %s236_s21 = sshll.u32 %s388_s9, 7  ;;  %s235_s22 = sshll.u32 %s87_s20, 3 }
  0x10   : > { %s568_s18 = scalar_select %p452_p11, 1, 0 }
  0x11   : > { %s569_s19 = scalar_select %p456_p12, 1, 0 }
  0x12   : > { %s465_s25 = scalar_lea.hbm %s563_s0, %s236_s21  ;;  %s91_s26 = scalar_lea.vmem [#allocation2], %s235_s22 }
  0x13   : > { %s98_s27 = sshll.u32 %s91_s26, 4  ;;  %p469_p13 = pnand %p258_p10, %p441_p5  ;;  %s473_s27 = int_to_ptr.vmem [resolvable:$true] %s98_s27 }
  0x14   : > { %s88_s29 = scalar_lea.sflag [#allocation3], %s87_s20  ;;  %s292_s30 = scalar_lea.hbm %s465_s25, 128 }
  0x15   : > { %p293_p2 = scmp.ne.s32.totalorder %s465_s25, %s292_s30  ;;  %p294_p3 = pneg %p469_p13 }
  0x16   : > { %s297_s4 = scalar_lea.hbm %s563_s0, 256  ;;  %p298_p5 = scmp.lt.u32.totalorder %s465_s25, %s563_s0 }
  0x17   : > { %p295_p4 = pnand %p294_p3, %p293_p2  ;;  %p299_p8 = scmp.lt.u32.totalorder %s297_s4, %s292_s30 }
  0x18   : > { %p301_p9 = scmp.lt.u32.totalorder %s292_s30, %s465_s25 }
  0x19   : > { %p296_p7 = pneg %p295_p4  ;;  %p300_p10 = por %p299_p8, %p298_p5 }
  0x1b   : > { %p302_p0 = por %p301_p9, %p300_p10 }
  0x1d   : > { %p303_p1 = pnand %p302_p0, %p296_p7 }
  0x1f   : > { %306 = shalt.err (!%p303_p1)
}
  0x20   : > { %s307_s13 = scalar_lea.vmem %s473_s27, 128  ;;  %s390_s14 = smov [#allocation2]  }
  0x21   : > { %p308_p2 = scmp.ne.s32.totalorder %s473_s27, %s307_s13  ;;  %s312_s16 = sshll.u32 %s390_s14, 4  ;;  %s313_s16 = int_to_ptr.vmem [resolvable:$false] %s312_s16 }
  0x22   : > { %s314_s20 = scalar_lea.vmem %s313_s16, 256  ;;  %p315_p11 = scmp.lt.s32.totalorder %s473_s27, %s313_s16 }
  0x23   : > { %p310_p4 = pnand %p308_p2, %p294_p3  ;;  %p316_p5 = scmp.lt.s32.totalorder %s314_s20, %s307_s13 }
  0x25   : > { %p311_p12 = pneg %p310_p4  ;;  %p317_p8 = por %p316_p5, %p315_p11 }
  0x27   : > { %p318_p9 = pnand %p317_p8, %p311_p12 }
  0x29   : > { %321 = shalt.err (!%p318_p9)
}
  0x2a   : > { %253 = dma.hbm_to_vmem [thread:$0]  (!%p469_p13), %s465_s25, 128, %s473_s27, %s88_s29  }
  0x2b   : > { %p571_p0 = scmp.lt.s32.totalorder %s388_s9, 3  ;;  %p572_p1 = scmp.ge.s32.totalorder %s388_s9, 1 }
  0x2d   : > { %p104_p3 = pnand %p572_p1, %p571_p0 }
  0x2e   : > { %s507_s21 = sand.u32 (!%p104_p3), 1, %s380_s7  }
  0x2f   : > { %107 = sbr.rel (%p104_p3) target bundleno = 98 (0x62), region = 24  ;;  %s238_s22 = sshll.u32 (!%p104_p3), %s507_s21, 3 }
  0x30   : > { %s110_s23 = scalar_lea.sflag (!%p104_p3), [#allocation3], %s507_s21  ;;  %s113_s24 = scalar_lea.vmem (!%p104_p3), [#allocation2], %s238_s22 }
  0x36   : > { %367 = dma.done.wait (%p445_p6), %s110_s23, 128  }
  0x37   : > { %369 = vsyncadd (%p445_p6), %s110_s23, 4294967168  ;;  %v132_v0 = vld [vmem:[%s113_s24] sm:$0xff]  ;;  %s131_s25 = scalar_lea.vmem [#allocation5], %s238_s22  ;;  %s241_s17 = sshll.u32 %s423_s10, 7 }
  0x38   : > { %v133_v1 = vmul.f32 20.0, %v132_v0  ;;  %s162_s26 = sshll.u32 %s131_s25, 4  ;;  %s521_s29 = scalar_lea.hbm %s564_s1, %s241_s17  ;;  %s516_s26 = int_to_ptr.vmem [resolvable:$true] %s162_s26 }
  0x39   : > { %s149_s30 = scalar_lea.sflag [#allocation4], %s507_s21  ;;  %s322_s2 = scalar_lea.vmem %s516_s26, 128 }
  0x3a   : > { %v244_v2 = vround.rtne.f32 %v133_v1  ;;  %p323_p6 = scmp.ne.s32.totalorder %s516_s26, %s322_s2  ;;  %p573_p11 = scmp.ne.s32.totalorder %s568_s18, 0 }
  0x3b   : > { %s391_s10 = smov [#allocation5]  }
  0x3c   : > { %v135_v3 = vmax.f32 %v244_v2, -128.0  ;;  %p324_p12 = pnand %p323_p6, %p573_p11  ;;  %s326_s3 = sshll.u32 %s391_s10, 4  ;;  %s327_s3 = int_to_ptr.vmem [resolvable:$false] %s326_s3 }
  0x3d   : > { %s328_s4 = scalar_lea.vmem %s327_s3, 256  ;;  %p329_p7 = scmp.lt.s32.totalorder %s516_s26, %s327_s3 }
  0x3e   : > { %v136_v4 = vmin.f32 %v135_v3, 127.0  ;;  %p325_p13 = pneg %p324_p12  ;;  %p330_p10 = scmp.lt.s32.totalorder %s328_s4, %s322_s2 }
  0x40   : > { %v137_v5 = vmul.f32 0.05, %v136_v4  ;;  %p331_p2 = por %p330_p10, %p329_p7 }
  0x42   : > { %v138_v6 = vadd.f32 3.0, %v137_v5  ;;  %p332_p4 = pnand %p331_p2, %p325_p13 }
  0x44   : > { %v139_v7 = vmax.f32 %v138_v6, 0.0 }
  0x46   : > { %v140_v8 = vmin.f32 %v139_v7, 6.0 }
  0x48   : > { %v141_v9 = vmul.f32 %v140_v8, %v136_v4 }
  0x4a   : > { %v142_v10 = vmul.f32 0.16666667, %v141_v9 }
  0x4c   : > { %v245_v11 = vround.rtne.f32 %v142_v10 }
  0x4e   : > { %v144_v12 = vmax.f32 %v245_v11, -128.0 }
  0x50   : > { %v145_v13 = vmin.f32 %v144_v12, 127.0 }
  0x52   : > { %v146_v14 = vmul.f32 0.05, %v145_v13 }
  0x54   : > { %147 = vst [vmem:[%s131_s25] sm:$0xff] %v146_v14 }
  0x55   : > { %335 = shalt.err (!%p332_p4)
}
  0x56   : > { %s336_s5 = scalar_lea.hbm %s521_s29, 128  ;;  %s340_s14 = scalar_lea.hbm %s564_s1, 256 }
  0x57   : > { %p337_p5 = scmp.ne.s32.totalorder %s521_s29, %s336_s5  ;;  %p341_p0 = scmp.lt.u32.totalorder %s521_s29, %s564_s1 }
  0x58   : > { %p342_p1 = scmp.lt.u32.totalorder %s340_s14, %s336_s5  ;;  %p344_p6 = scmp.lt.u32.totalorder %s336_s5, %s521_s29 }
  0x59   : > { %p338_p8 = pnand %p337_p5, %p573_p11 }
  0x5a   : > { %p343_p3 = por %p342_p1, %p341_p0 }
  0x5b   : > { %p339_p9 = pneg %p338_p8 }
  0x5c   : > { %p345_p12 = por %p344_p6, %p343_p3 }
  0x5e   : > { %p346_p13 = pnand %p345_p12, %p339_p9 }
  0x60   : > { %349 = shalt.err (!%p346_p13)
}
  0x61   : > { %248 = dma.vmem_to_hbm [thread:$0]  (%p573_p11), %s516_s26, 128, %s521_s29, %s149_s30  }
  0x62 PF: > { %s174_s21 = sand.u32 1, %s376_s6   ;;  %p574_p7 = scmp.ne.s32.totalorder %s569_s19, 0 }
  0x63   : > { %p575_p10 = scmp.ge.s32.totalorder %s388_s9, 2  ;;  %s175_s22 = scalar_lea.sflag [#allocation4], %s174_s21 }
  0x65   : > { %p255_p2 = pnand %p575_p10, %p574_p7 }
  0x67   : > { %371 = dma.done.wait (!%p255_p2), %s175_s22, 128  }
  0x68   : > { %373 = vsyncadd (!%p255_p2), %s175_s22, 4294967168  ;;  %p14_p4 = scmp.ge.s32.totalorder %s427_s12, 4   ;;  %s576_s6 = smov %s380_s7 }
  0x69   : > { %s577_s7 = smov %s384_s8  ;;  %s578_s8 = smov %s439_s15 }
  0x6a   : > { %s579_s9 = smov %s427_s12  ;;  %16 = sbr.rel (!%p14_p4) target bundleno = 5 (0x5), region = 69 }
  0x71   :  { %180 = vsyncpa [#allocation3], 1 }
  0x72   :  { %182 = vsyncpa [#allocation3 + $0x1], 1 }
  0x73   :  { %183 = vsyncpa [#allocation4], 1 }
  0x74   :  { %185 = vsyncpa [#allocation4 + $0x1], 1 }

</bundles_post_ra>
